<compile_context>
chip_gen: v7x
topology: tpu7x:2x2x1
jax: 0.10.0
libtpu: 0.0.40
codegen_flags: <defaults>
</compile_context>

<pallas_src>
import jax
import jax.numpy as jnp
from jax.experimental import pallas as pl
from jax.experimental.pallas import tpu as pltpu


# --------------------------------------------------------------------------- #
# Kernels: one (tm, tn) output tile; grid axis 2 is the K reduction.
#   x_ref: (tm, tk) compute dtype (bf16)
#   w_ref: (tk, tn) compute dtype (bf16)  -- weight pre-transposed to (K, N)
#   b_ref: (1, tn)  f32                   -- only in the bias-specialized kernel
#   o_ref: (tm, tn) output dtype
#   acc_ref: (tm, tn) f32 scratch accumulator
# --------------------------------------------------------------------------- #
def _rpl_kernel_bias(x_ref, w_ref, b_ref, o_ref, acc_ref):
    k = pl.program_id(2)

    @pl.when(k == 0)
    def _():
        acc_ref[...] = jnp.zeros_like(acc_ref)

    acc_ref[...] += jnp.dot(x_ref[...], w_ref[...],
                            preferred_element_type=jnp.float32)

    @pl.when(k == pl.num_programs(2) - 1)
    def _():
        o_ref[...] = (acc_ref[...] + b_ref[...].astype(jnp.float32)).astype(o_ref.dtype)


def _rpl_kernel_nobias(x_ref, w_ref, o_ref, acc_ref):
    k = pl.program_id(2)

    @pl.when(k == 0)
    def _():
        acc_ref[...] = jnp.zeros_like(acc_ref)

    acc_ref[...] += jnp.dot(x_ref[...], w_ref[...],
                            preferred_element_type=jnp.float32)

    @pl.when(k == pl.num_programs(2) - 1)
    def _():
        o_ref[...] = acc_ref[...].astype(o_ref.dtype)


# --------------------------------------------------------------------------- #
# Hardware-aware defaults
# --------------------------------------------------------------------------- #
def _chip_info():
    kind = ""
    try:
        kind = jax.devices()[0].device_kind.lower()
    except Exception:
        pass
    if "v7" in kind:
        gen = "v7x"
    elif "v6" in kind:
        gen = "v6"
    elif "v5e" in kind or "v5 lite" in kind or "v5lite" in kind:
        gen = "v5e"
    elif "v5" in kind:
        gen = "v5p"
    else:
        gen = "unknown"
    try:
        vmem_cap = int(pltpu.get_tpu_info().vmem_capacity_bytes)
    except Exception:
        vmem_cap = (64 << 20) if gen == "v7x" else (128 << 20)
    return gen, vmem_cap


def _default_tiles(gen):
    """(tm_cap, tn_cap, tk_cap, weight_buffer_count) per chip generation."""
    if gen == "v7x":
        # 64 MiB VMEM per TC: keep the double-buffered footprint well under ~56 MiB.
        return 1024, 1024, 512, 2
    if gen == "v5e":
        # Already compute-bound at these sizes; spend VMEM on deeper W buffering.
        return 512, 1024, 512, 3
    # v6e / v5p / unknown: 128 MiB VMEM.
    return 1024, 2048, 1024, 2


def _choose_tile(dim, preferred, align):
    """Tile size + zero-padded extent for one dimension.

    Small dims (<= preferred) use one full-extent block (always legal).
    Large dims use an `align`-rounded tile and pad up to a multiple of it.
    """
    if dim <= preferred:
        return dim, dim
    tile = ((preferred + align - 1) // align) * align
    padded = ((dim + tile - 1) // tile) * tile
    return tile, padded


# --------------------------------------------------------------------------- #
# Layer construction: ONE-TIME weight preparation, returns forward(x).
# --------------------------------------------------------------------------- #
def make_row_parallel_linear(weight, bias=None, *, skip_bias_add=False,
                             compute_dtype=jnp.bfloat16, out_dtype=None,
                             tm=None, tn=None, tk=None):
    """Prepare a RowParallelLinear layer and return forward(x) -> (out, out_bias).

    weight: (output_size, input_size)  -- PyTorch nn.Linear layout, NOT transposed
    bias:   (output_size,) or None

    NOTE: operands are fed to the MXU in `compute_dtype` (bf16 by default), i.e.
    results are quantized relative to an fp32 PyTorch reference; accumulation and
    the bias add stay fp32.
    """
    weight = jnp.asarray(weight)
    N, K = weight.shape

    gen, vmem_cap = _chip_info()
    d_tm, d_tn, d_tk, w_bufs = _default_tiles(gen)

    cdt_bytes = jnp.dtype(compute_dtype).itemsize
    m_align = 16 if cdt_bytes == 2 else 8            # bf16 packs 16 rows / vreg

    tm_cap = tm if tm is not None else d_tm
    tn_sel, Np = _choose_tile(N, tn if tn is not None else d_tn, 128)
    tk_sel, Kp = _choose_tile(K, tk if tk is not None else d_tk, 128)

    # v7x megacore: ensure the N ("parallel") axis has extent >= 2 so both
    # TensorCores get work even when M is tiny (decode).
    if gen == "v7x" and tn is None and N >= 512:
        while Np // tn_sel < 2 and tn_sel > 256:
            new_tn = max(256, ((tn_sel // 2 + 127) // 128) * 128)
            if new_tn == tn_sel:
                break
            tn_sel = new_tn
            Np = ((N + tn_sel - 1) // tn_sel) * tn_sel

    add_bias = (bias is not None) and (not skip_bias_add)

    # ---- one-time weight prep: cast -> transpose to (K, N) -> pad K/N ----
    w_kn = weight.astype(compute_dtype).T            # (K, N)
    if Kp != K or Np != N:
        w_kn = jnp.pad(w_kn, ((0, Kp - K), (0, Np - N)))

    if add_bias:
        b_row = jnp.asarray(bias).astype(jnp.float32).reshape(1, N)
        if Np != N:
            b_row = jnp.pad(b_row, ((0, 0), (0, Np - N)))
    else:
        b_row = None

    kernel = _rpl_kernel_bias if add_bias else _rpl_kernel_nobias

    if w_bufs > 2:
        w_spec = pl.BlockSpec((tk_sel, tn_sel), lambda i, j, k: (k, j),
                              pipeline_mode=pl.Buffered(w_bufs))
    else:
        w_spec = pl.BlockSpec((tk_sel, tn_sel), lambda i, j, k: (k, j))

    def forward(x):
        *lead, Kx = x.shape
        assert Kx == K, (Kx, K)
        odt = out_dtype if out_dtype is not None else x.dtype
        out_bytes = jnp.dtype(odt).itemsize

        x2 = x.reshape(-1, K).astype(compute_dtype)
        M = x2.shape[0]
        tm_sel, Mp = _choose_tile(M, tm_cap, m_align)
        if Mp != M or Kp != K:                        # no-op for divisible shapes
            x2 = jnp.pad(x2, ((0, Mp - M), (0, Kp - K)))

        grid = (Mp // tm_sel, Np // tn_sel, Kp // tk_sel)
        n_i, n_j, _ = grid

        in_specs = [pl.BlockSpec((tm_sel, tk_sel), lambda i, j, k: (i, k)), w_spec]
        args = [x2, w_kn]
        if add_bias:
            in_specs.append(pl.BlockSpec((1, tn_sel), lambda i, j, k: (0, j)))
            args.append(b_row)

        cost = pl.CostEstimate(
            flops=2 * M * N * K,
            transcendentals=0,
            bytes_accessed=(
                n_j * Mp * Kp * cdt_bytes          # X re-read per N tile
                + n_i * Kp * Np * cdt_bytes        # W re-read per M tile
                + (n_i * Np * 4 if add_bias else 0)
                + Mp * Np * out_bytes              # Y write
            ),
        )

        vmem_needed = (
            2 * tm_sel * tk_sel * cdt_bytes            # X double buffer
            + w_bufs * tk_sel * tn_sel * cdt_bytes     # W buffers
            + (2 * tn_sel * 4 if add_bias else 0)      # bias buffers
            + 2 * tm_sel * tn_sel * out_bytes          # output double buffer
            + tm_sel * tn_sel * 4                      # f32 accumulator
        )
        # Clamp to physical VMEM (v7x has only 64 MiB per TC).
        vmem_limit = min(int(vmem_cap * 0.85),
                         max(int(vmem_needed * 3 // 2), 32 * 1024 * 1024))

        out = pl.pallas_call(
            kernel,
            out_shape=jax.ShapeDtypeStruct((Mp, Np), odt),
            grid_spec=pltpu.PrefetchScalarGridSpec(
                num_scalar_prefetch=0,
                grid=grid,
                in_specs=in_specs,
                out_specs=pl.BlockSpec((tm_sel, tn_sel), lambda i, j, k: (i, j)),
                scratch_shapes=[pltpu.VMEM((tm_sel, tn_sel), jnp.float32)],
            ),
            compiler_params=pltpu.CompilerParams(
                dimension_semantics=("parallel", "parallel", "arbitrary"),
                vmem_limit_bytes=vmem_limit,
            ),
            cost_estimate=cost,
        )(*args)

        if Mp != M or Np != N:
            out = out[:M, :N]
        out = out.reshape(*lead, N)

        output_bias = bias if skip_bias_add else None
        return out, output_bias

    return forward


def row_parallel_linear(x, weight, bias=None, **kwargs):
    """One-shot convenience wrapper.

    Prefer make_row_parallel_linear(...) at model-load time so the weight
    cast/transpose/pad is not paid on every forward.
    """
    return make_row_parallel_linear(weight, bias, **kwargs)(x)


# --------------------------------------------------------------------------- #
# Tests
# --------------------------------------------------------------------------- #
if __name__ == "__main__":
    key = jax.random.PRNGKey(0)
    kx, kw, kb = jax.random.split(key, 3)

    # ---- Test 1: small shapes, single full-extent block ----
    batch, seq, input_size, output_size = 2, 4, 32, 32
    x = jax.random.normal(kx, (batch, seq, input_size), dtype=jnp.float32)
    weight = 0.05 * jax.random.normal(kw, (output_size, input_size), dtype=jnp.float32)
    bias = 0.1 * jax.random.normal(kb, (output_size,), dtype=jnp.float32)

    layer = make_row_parallel_linear(weight, bias)      # weight prep hoisted here
    out, out_bias = layer(x)
    out = jax.block_until_ready(out)

    # Reference with the same bf16 operand quantization (f32 accumulation).
    xq = x.astype(jnp.bfloat16).astype(jnp.float32)
    wq = weight.astype(jnp.bfloat16).astype(jnp.float32)
    ref = (
        jnp.dot(xq.reshape(-1, input_size), wq.T, precision=jax.lax.Precision.HIGHEST)
        + bias
    ).reshape(batch, seq, output_size)

    assert out.shape == (batch, seq, output_size)
    assert out_bias is None
    assert jnp.allclose(out, ref, atol=2e-3, rtol=2e-3), float(jnp.max(jnp.abs(out - ref)))

    # skip_bias_add semantics: bias is returned, not added.
    layer_nb = make_row_parallel_linear(weight, bias, skip_bias_add=True)
    out_nb, out_bias_nb = layer_nb(x)
    out_nb = jax.block_until_ready(out_nb)
    assert out_bias_nb is bias
    assert jnp.allclose(out_nb + bias, ref, atol=2e-3, rtol=2e-3)

    # ---- Test 2: tiled + non-divisible N (exercises N padding / K reduction) ----
    k2x, k2w, k2b = jax.random.split(jax.random.PRNGKey(1), 3)
    b2_, s2_, K2_, N2_ = 2, 8, 384, 640
    x2 = jax.random.normal(k2x, (b2_, s2_, K2_), dtype=jnp.float32)
    w2 = 0.02 * jax.random.normal(k2w, (N2_, K2_), dtype=jnp.float32)
    bb2 = 0.1 * jax.random.normal(k2b, (N2_,), dtype=jnp.float32)

    layer2 = make_row_parallel_linear(w2, bb2, tn=256, tk=128)
    out2, _ = layer2(x2)
    out2 = jax.block_until_ready(out2)

    x2q = x2.astype(jnp.bfloat16).astype(jnp.float32)
    w2q = w2.astype(jnp.bfloat16).astype(jnp.float32)
    ref2 = (
        jnp.dot(x2q.reshape(-1, K2_), w2q.T, precision=jax.lax.Precision.HIGHEST) + bb2
    ).reshape(b2_, s2_, N2_)
    assert out2.shape == (b2_, s2_, N2_)
    assert jnp.allclose(out2, ref2, atol=1e-2, rtol=1e-2), float(jnp.max(jnp.abs(out2 - ref2)))

    # ---- Test 3: no-bias specialized kernel, default (HW-tuned) tiles ----
    layer3 = make_row_parallel_linear(w2, None)
    out3, out_bias3 = layer3(x2)
    out3 = jax.block_until_ready(out3)
    ref3 = jnp.dot(
        x2q.reshape(-1, K2_), w2q.T, precision=jax.lax.Precision.HIGHEST
    ).reshape(b2_, s2_, N2_)
    assert out_bias3 is None
    assert jnp.allclose(out3, ref3, atol=1e-2, rtol=1e-2), float(jnp.max(jnp.abs(out3 - ref3)))

    print("KERNEL_OK")
</pallas_src>

<mosaic_0001>
module attributes {stable_mosaic.version = 11 : i64} {
  func.func @_rpl_kernel_bias(%arg0: i32, %arg1: i32, %arg2: i32, %arg3: memref<8x32xbf16, #tpu.memory_space<vmem>>, %arg4: memref<32x32xbf16, #tpu.memory_space<vmem>>, %arg5: memref<1x32xf32, #tpu.memory_space<vmem>>, %arg6: memref<8x32xf32, #tpu.memory_space<vmem>>, %arg7: memref<8x32xf32, #tpu.memory_space<vmem>>) attributes {dimension_semantics = [#tpu.dimension_semantics<parallel>, #tpu.dimension_semantics<parallel>, #tpu.dimension_semantics<arbitrary>], iteration_bounds = array<i64: 1, 1, 1>, scalar_prefetch = 0 : i64, scratch_operands = 1 : i64, tpu.core_type = #tpu.core_type<tc>, window_params = [{transform_indices = @transform_0, window_bounds = array<i64: 8, 32>}, {transform_indices = @transform_1, window_bounds = array<i64: 32, 32>}, {transform_indices = @transform_2, window_bounds = array<i64: 1, 32>}, {transform_indices = @transform_3, window_bounds = array<i64: 8, 32>}]} {
    %c0_i32 = arith.constant 0 : i32
    %0 = arith.cmpi eq, %arg2, %c0_i32 : i32
    %1 = arith.extui %0 : i1 to i32
    %c0_i32_0 = arith.constant 0 : i32
    %2 = arith.cmpi ne, %1, %c0_i32_0 : i32
    scf.if %2 {
      %cst_10 = arith.constant 0.000000e+00 : f32
      %12 = vector.broadcast %cst_10 : f32 to vector<8x32xf32>
      %c0_11 = arith.constant 0 : index
      %c0_12 = arith.constant 0 : index
      %13 = vector.load %arg7[%c0_11, %c0_12] : memref<8x32xf32, #tpu.memory_space<vmem>>, vector<8x32xf32>
      tpu.vector_store %arg7[%c0_11, %c0_12], %12 {strides = array<i32>} : memref<8x32xf32, #tpu.memory_space<vmem>>, vector<8x32xf32>,
    } else {
    }
    %c0 = arith.constant 0 : index
    %c0_1 = arith.constant 0 : index
    %3 = vector.load %arg7[%c0, %c0_1] : memref<8x32xf32, #tpu.memory_space<vmem>>, vector<8x32xf32>
    %c0_2 = arith.constant 0 : index
    %c0_3 = arith.constant 0 : index
    %4 = vector.load %arg3[%c0_2, %c0_3] : memref<8x32xbf16, #tpu.memory_space<vmem>>, vector<8x32xbf16>
    %c0_4 = arith.constant 0 : index
    %c0_5 = arith.constant 0 : index
    %5 = vector.load %arg4[%c0_4, %c0_5] : memref<32x32xbf16, #tpu.memory_space<vmem>>, vector<32x32xbf16>
    %cst = arith.constant dense<0.000000e+00> : vector<8x32xf32>
    %6 = tpu.matmul %4, %5, %cst {dimension_numbers = #tpu.dot_dimension_numbers<[1], [0], [0], [1], [0, 0, 1, 1], [], []>} : vector<8x32xbf16>, vector<32x32xbf16>, vector<8x32xf32> -> vector<8x32xf32>
    %7 = arith.addf %3, %6 : vector<8x32xf32>
    %c0_6 = arith.constant 0 : index
    %c0_7 = arith.constant 0 : index
    %8 = vector.load %arg7[%c0_6, %c0_7] : memref<8x32xf32, #tpu.memory_space<vmem>>, vector<8x32xf32>
    tpu.vector_store %arg7[%c0_6, %c0_7], %7 {strides = array<i32>} : memref<8x32xf32, #tpu.memory_space<vmem>>, vector<8x32xf32>,
    %c0_i32_8 = arith.constant 0 : i32
    %9 = arith.cmpi eq, %arg2, %c0_i32_8 : i32
    %10 = arith.extui %9 : i1 to i32
    %c0_i32_9 = arith.constant 0 : i32
    %11 = arith.cmpi ne, %10, %c0_i32_9 : i32
    scf.if %11 {
      %c0_10 = arith.constant 0 : index
      %c0_11 = arith.constant 0 : index
      %12 = vector.load %arg7[%c0_10, %c0_11] : memref<8x32xf32, #tpu.memory_space<vmem>>, vector<8x32xf32>
      %c0_12 = arith.constant 0 : index
      %c0_13 = arith.constant 0 : index
      %13 = vector.load %arg5[%c0_12, %c0_13] : memref<1x32xf32, #tpu.memory_space<vmem>>, vector<1x32xf32>
      %14 = vector.broadcast %13 : vector<1x32xf32> to vector<8x32xf32>
      %15 = arith.addf %12, %14 : vector<8x32xf32>
      %c0_14 = arith.constant 0 : index
      %c0_15 = arith.constant 0 : index
      %16 = vector.load %arg6[%c0_14, %c0_15] : memref<8x32xf32, #tpu.memory_space<vmem>>, vector<8x32xf32>
      tpu.vector_store %arg6[%c0_14, %c0_15], %15 {strides = array<i32>} : memref<8x32xf32, #tpu.memory_space<vmem>>, vector<8x32xf32>,
    } else {
    }
    return
  }
  func.func @transform_0(%arg0: i32, %arg1: i32, %arg2: i32) -> (i32, i32) {
    %c0_i32 = arith.constant 0 : i32
    return %arg0, %arg2 : i32, i32
  }
  func.func @transform_1(%arg0: i32, %arg1: i32, %arg2: i32) -> (i32, i32) {
    %c0_i32 = arith.constant 0 : i32
    return %arg2, %arg1 : i32, i32
  }
  func.func @transform_2(%arg0: i32, %arg1: i32, %arg2: i32) -> (i32, i32) {
    %c0_i32 = arith.constant 0 : i32
    %c0_i32_0 = arith.constant 0 : i32
    return %c0_i32, %arg1 : i32, i32
  }
  func.func @transform_3(%arg0: i32, %arg1: i32, %arg2: i32) -> (i32, i32) {
    %c0_i32 = arith.constant 0 : i32
    return %arg0, %arg1 : i32, i32
  }
}

</mosaic_0001>

<bundles_post_ra>
// kernel: tpu_custom_call.1
= control target key start
LH: loop header
LB: loop body
LE: loop exit
PB: predicated region body
PF: predicated region fallthrough
CT: control target
= control target key end

     0   :  { %8 = vsyncpa [#allocation4], 0  ;;  %s314_s0 = inlined_call_operand.hbm [shape: bf16[8,32], index: 0, kind: input, shape index: {}]   ;;  %s315_s1 = inlined_call_operand.hbm [shape: bf16[32,32], index: 1, kind: input, shape index: {}]   ;;  %s316_s2 = inlined_call_operand.vmem [shape: f32[1,32], index: 2, kind: input, shape index: {}]   ;;  %s317_s3 = inlined_call_operand.hbm [shape: f32[8,32], index: 3, kind: output, shape index: {}]  }
   0x1   :  { %9 = vsyncpa [#allocation7], 0 }
   0x2   :  { %10 = vsyncpa [#allocation5], 0  ;;  %s237_s12 = smov [#allocation3]   ;;  %s238_s14 = smov [#allocation6]  }
   0x3   :  { %s17_s13 = sshll.u32 %s237_s12, 4  ;;  %s26_s15 = sshll.u32 %s238_s14, 4  ;;  %s18_s13 = int_to_ptr.vmem [resolvable:$true] %s17_s13  ;;  %s264_s15 = int_to_ptr.vmem [resolvable:$true] %s26_s15 }
   0x4   :  { %s165_s18 = scalar_lea.hbm %s314_s0, 64 }
   0x5   :  { %p166_p0 = scmp.ne.s32.totalorder %s314_s0, %s165_s18  ;;  %p169_p1 = scmp.lt.u32.totalorder %s165_s18, %s314_s0 }
   0x7   :  { %p171_p2 = pnand %p169_p1, %p166_p0 }
   0x9   :  { %174 = shalt.err (!%p171_p2)
}
   0xa   :  { %s175_s23 = scalar_lea.vmem %s18_s13, 64  ;;  %p180_p4 = scmp.lt.s32.totalorder %s18_s13, %s18_s13 }
   0xb   :  { %p176_p3 = scmp.ne.s32.totalorder %s18_s13, %s175_s23  ;;  %p181_p5 = scmp.lt.s32.totalorder %s175_s23, %s175_s23 }
   0xd   :  { %p182_p6 = por %p181_p5, %p180_p4 }
   0xf   :  { %p183_p7 = pnand %p182_p6, %p176_p3 }
  0x11   :  { %186 = shalt.err (!%p183_p7)
}
  0x12   :  { %20 = dma.hbm_to_vmem [thread:$0]  %s314_s0, 64, %s18_s13, [#allocation4]  }
  0x13   :  { %s187_s28 = scalar_lea.hbm %s315_s1, 256 }
  0x14   :  { %p188_p8 = scmp.ne.s32.totalorder %s315_s1, %s187_s28  ;;  %p191_p9 = scmp.lt.u32.totalorder %s187_s28, %s315_s1 }
  0x16   :  { %p193_p10 = pnand %p191_p9, %p188_p8 }
  0x18   :  { %196 = shalt.err (!%p193_p10)
}
  0x19   :  { %s197_s6 = scalar_lea.vmem %s264_s15, 256  ;;  %p202_p12 = scmp.lt.s32.totalorder %s264_s15, %s264_s15 }
  0x1a   :  { %p198_p11 = scmp.ne.s32.totalorder %s264_s15, %s197_s6  ;;  %p203_p13 = scmp.lt.s32.totalorder %s197_s6, %s197_s6 }
  0x1c   :  { %p204_p0 = por %p203_p13, %p202_p12 }
  0x1e   :  { %p205_p1 = pnand %p204_p0, %p198_p11 }
  0x20   :  { %208 = shalt.err (!%p205_p1)
}
  0x21   :  { %s239_s0 = smov 64   ;;  %s240_s7 = smov 4  }
  0x22   :  { %32 = dma.hbm_to_vmem [thread:$0]  %s315_s1, 256, %s264_s15, [#allocation7], %s239_s0, %s239_s0, %s240_s7  }
  0x23   :  { %231 = dma.done.wait [#allocation4], 64  }
  0x24   :  { %232 = vsyncadd [#allocation4], 4294967232 }
  0x25   :  { %233 = dma.done.wait [#allocation7], 256  }
  0x26   :  { %234 = vsyncadd [#allocation7], 4294967040  ;;  %vm46_vm0 = vcmask 261120   ;;  %v241_v0 = vmov 0.0   ;;  %vm242_vm1 = vmmov 0   ;;  %v163_v1 = vld [vmem:[#allocation6] sm:$0xff]  }
  0x27   :  { %148 = vmatprep.subr.bf16.mxu0 %v241_v0  ;;  %152 = vmatprep.mubr.msk.bf16.mxu0 %vm242_vm1, %v241_v0  ;;  %47 = vst.msk [vmem:[#allocation2] sm:$0xff] %vm46_vm0, %v241_v0  ;;  %v164_v2 = vld [vmem:[#allocation6 + $0x8] sm:$0xff]   ;;  %v49_v3 = vld [vmem:[#allocation3] sm:$0xf]  ;;  %v144_v10 = vld [vmem:[%s316_s2] ss:$0 sm:$0xff] }
  0x28   :  { %149 = vmatpush3.bf16.msra.mxu0 %v163_v1  ;;  %s243_s11 = smov [#allocation8]  }
  0x29   :  { %150 = vmatprep.subr.bf16.mxu0 %v241_v0  ;;  %s131_s12 = sshll.u32 %s243_s11, 4  ;;  %s132_s12 = int_to_ptr.vmem [resolvable:$true] %s131_s12 }
  0x2a   :  { %s209_s13 = scalar_lea.vmem %s132_s12, 128  ;;  %p214_p3 = scmp.lt.s32.totalorder %s132_s12, %s132_s12 }
  0x2b   :  { %p210_p2 = scmp.ne.s32.totalorder %s132_s12, %s209_s13  ;;  %p215_p4 = scmp.lt.s32.totalorder %s209_s13, %s209_s13 }
  0x2c   :  { %151 = vmatpush3.bf16.msra.mxu0 %v164_v2 }
  0x2d   :  { %p216_p5 = por %p215_p4, %p214_p3 }
  0x2e   :  { %v48_v4 = vld [vmem:[#allocation2] sm:$0xff] }
  0x2f   :  { %153 = vmatmul.mubr.msk.bf16.vlgmr.msra.gmra.mrb[0].mxu0 %vm46_vm0, %v49_v3  ;;  %p217_p6 = pnand %p216_p5, %p210_p2 }
 0x102   :  { %v104_v5 = vpop.f32.mrb[0].mxu0 }
 0x103   :  { %v110_v6 = vadd.f32 %v104_v5, %v48_v4  ;;  %v154_v7 = vpop.f32.mrb[1].mxu0 }
 0x104   :  { %v107_v8 = vpop.f32.mrb[2].mxu0 }
 0x105   :  { %111 = vst.msk [vmem:[#allocation2] sm:$0xff] %vm46_vm0, %v110_v6  ;;  %v155_v9 = vpop.f32.mrb[3].mxu0 }
 0x10c   :  { %v115_v11 = vld [vmem:[#allocation2] sm:$0xff] }
 0x10d   :  { %v123_v12 = vadd.f32 %v144_v10, %v115_v11 }
 0x10f   :  { %124 = vst.msk [vmem:[#allocation8] sm:$0xff] %vm46_vm0, %v123_v12 }
 0x110   :  { %220 = shalt.err (!%p217_p6)
}
 0x111   :  { %s221_s16 = scalar_lea.hbm %s317_s3, 128 }
 0x112   :  { %p222_p7 = scmp.ne.s32.totalorder %s317_s3, %s221_s16  ;;  %p225_p8 = scmp.lt.u32.totalorder %s221_s16, %s317_s3 }
 0x114   :  { %p227_p9 = pnand %p225_p8, %p222_p7 }
 0x116   :  { %230 = shalt.err (!%p227_p9)
}
 0x117   :  { %134 = dma.vmem_to_hbm [thread:$0]  %s132_s12, 128, %s317_s3, [#allocation5]  }
 0x118   :  { %235 = dma.done.wait [#allocation5], 128  }
 0x119   :  { %236 = vsyncadd [#allocation5], 4294967168 }
 0x11a   :  { %138 = vsyncpa [#allocation4], 1 }
 0x11b   :  { %139 = vsyncpa [#allocation7], 1 }
 0x11c   :  { %140 = vsyncpa [#allocation5], 1 }

</bundles_post_ra>
